<compile_context>
chip_gen: v6e
topology: v6e:2x2x1
jax: 0.10.0
libtpu: 0.0.40
codegen_flags: <defaults>
</compile_context>

<pallas_src>
import math
import functools

import jax
import jax.numpy as jnp
from jax.experimental import pallas as pl
from jax.experimental.pallas import tpu as pltpu


def _mha_rope_kernel(x_ref, wq_ref, bq_ref, wk_ref, bk_ref, wv_ref, bv_ref,
                     wo_ref, bo_ref, cosq_ref, sinq_ref, cosk_ref, sink_ref,
                     o_ref, kr_sc, v_sc, *, q_tile: int):
    """One grid step = (batch b, query tile qi, head h)."""
    qi = pl.program_id(1)
    h = pl.program_id(2)
    hd = wq_ref.shape[2]
    half = hd // 2

    def rot_half(t):  # (n, hd): swap the two halves of the head dim.
        return jnp.concatenate([t[:, half:], t[:, :half]], axis=-1)

    # ---- K / V for this (batch, head): computed once (qi == 0) and kept
    #      resident in bf16 VMEM scratch for all query tiles of this batch. ----
    @pl.when(qi == 0)
    def _():
        x_all = x_ref[0].astype(jnp.bfloat16)                          # (T, D)
        k = jnp.dot(x_all, wk_ref[0],
                    preferred_element_type=jnp.float32) + bk_ref[0]    # (T, hd) f32
        v = jnp.dot(x_all, wv_ref[0],
                    preferred_element_type=jnp.float32) + bv_ref[0]    # (T, hd) f32
        kr = k * cosk_ref[...] + rot_half(k) * sink_ref[...]           # RoPE in f32
        kr_sc[h] = kr.astype(jnp.bfloat16)
        v_sc[h] = v.astype(jnp.bfloat16)

    # ---- Q for this query tile / head (1/sqrt(hd) folded into cos_q/sin_q). ----
    q0 = pl.multiple_of(qi * q_tile, q_tile)
    xq = x_ref[0, pl.ds(q0, q_tile), :].astype(jnp.bfloat16)           # (TQ, D)
    q = jnp.dot(xq, wq_ref[0],
                preferred_element_type=jnp.float32) + bq_ref[0]        # (TQ, hd)
    qr = q * cosq_ref[...] + rot_half(q) * sinq_ref[...]               # f32

    # ---- Attention scores: contract last dims directly (no K transpose). ----
    s = jax.lax.dot_general(qr.astype(jnp.bfloat16), kr_sc[h],
                            (((1,), (1,)), ((), ())),
                            preferred_element_type=jnp.float32)        # (TQ, T)
    s = s - jnp.max(s, axis=-1, keepdims=True)
    p = jnp.exp(s)
    p = p * pl.reciprocal(jnp.sum(p, axis=-1, keepdims=True), approx=True)

    ctx = jnp.dot(p.astype(jnp.bfloat16), v_sc[h],
                  preferred_element_type=jnp.float32)                  # (TQ, hd)

    # ---- Output projection decomposed per head; accumulate into the
    #      lane-dense (TQ, D) output block (bias added on the first head). ----
    part = jnp.dot(ctx.astype(jnp.bfloat16), wo_ref[0],
                   preferred_element_type=jnp.float32)                 # (TQ, D)

    @pl.when(h == 0)
    def _():
        o_ref[0] = (part + bo_ref[...]).astype(o_ref.dtype)

    @pl.when(h != 0)
    def _():
        o_ref[0] = o_ref[0] + part.astype(o_ref.dtype)


def mha_rope_pallas(x, params, num_heads, *, q_tile=None):
    """x: (B, T, D) float32.  params: torch-layout weights/biases."""
    B, T, D = x.shape
    assert D % num_heads == 0, "d_model must be divisible by num_heads"
    hd = D // num_heads
    assert hd % 2 == 0, "RoPE requires an even head dimension"
    half = hd // 2

    if q_tile is None:
        q_tile = T if T <= 128 else 128
    assert T % q_tile == 0 and (q_tile == T or q_tile % 8 == 0)
    nq = T // q_tile

    # RoPE tables at full head width; rotation sign folded into sin, softmax
    # scale 1/sqrt(hd) folded into the query-side tables.  Kept in f32.
    pos = jnp.arange(T, dtype=jnp.float32)[:, None]
    inv_freq = 1.0 / (10000.0 ** (jnp.arange(half, dtype=jnp.float32) / half))
    ang = pos * inv_freq[None, :]                               # (T, half)
    sin_h, cos_h = jnp.sin(ang), jnp.cos(ang)
    cos_full = jnp.concatenate([cos_h, cos_h], axis=-1)         # (T, hd)
    sin_signed = jnp.concatenate([-sin_h, sin_h], axis=-1)      # (T, hd)
    scale = 1.0 / math.sqrt(hd)
    cos_q, sin_q = cos_full * scale, sin_signed * scale
    cos_k, sin_k = cos_full, sin_signed

    bf16 = jnp.bfloat16
    # nn.Linear stores W as (out, in); reorganize into head-major (in, out)
    # form in the wrapper so the kernel never slices the lane dim per head.
    wq_h = params["wq"].T.reshape(D, num_heads, hd).transpose(1, 0, 2).astype(bf16)
    wk_h = params["wk"].T.reshape(D, num_heads, hd).transpose(1, 0, 2).astype(bf16)
    wv_h = params["wv"].T.reshape(D, num_heads, hd).transpose(1, 0, 2).astype(bf16)
    wo_h = params["wo"].T.reshape(num_heads, hd, D).astype(bf16)        # (H, hd, D)
    bq_h = params["bq"].reshape(num_heads, 1, hd).astype(jnp.float32)
    bk_h = params["bk"].reshape(num_heads, 1, hd).astype(jnp.float32)
    bv_h = params["bv"].reshape(num_heads, 1, hd).astype(jnp.float32)
    bo = params["bo"].reshape(1, D).astype(jnp.float32)

    w_spec = pl.BlockSpec((1, D, hd), lambda b, qi, h: (h, 0, 0))
    b_spec = pl.BlockSpec((1, 1, hd), lambda b, qi, h: (h, 0, 0))

    kernel = functools.partial(_mha_rope_kernel, q_tile=q_tile)

    # TODO(synk): for very long sequences on v7x (64 MiB VMEM) tile the KV axis
    # flash-style (online softmax) instead of keeping full-T K/V resident, and
    # raise vmem_limit_bytes in CompilerParams when enlarging tiles.
    return pl.pallas_call(
        kernel,
        out_shape=jax.ShapeDtypeStruct((B, T, D), x.dtype),
        grid=(B, nq, num_heads),
        in_specs=[
            pl.BlockSpec((1, T, D), lambda b, qi, h: (b, 0, 0)),       # x (full seq)
            w_spec,                                                    # wq (head h)
            b_spec,                                                    # bq
            w_spec,                                                    # wk
            b_spec,                                                    # bk
            w_spec,                                                    # wv
            b_spec,                                                    # bv
            pl.BlockSpec((1, hd, D), lambda b, qi, h: (h, 0, 0)),      # wo rows of head h
            pl.BlockSpec((1, D), lambda b, qi, h: (0, 0)),             # bo
            pl.BlockSpec((q_tile, hd), lambda b, qi, h: (qi, 0)),      # cos_q (scaled)
            pl.BlockSpec((q_tile, hd), lambda b, qi, h: (qi, 0)),      # sin_q (scaled)
            pl.BlockSpec((T, hd), lambda b, qi, h: (0, 0)),            # cos_k
            pl.BlockSpec((T, hd), lambda b, qi, h: (0, 0)),            # sin_k
        ],
        out_specs=pl.BlockSpec((1, q_tile, D), lambda b, qi, h: (b, qi, 0)),
        scratch_shapes=[
            pltpu.VMEM((num_heads, T, hd), jnp.bfloat16),   # RoPE'd K, resident
            pltpu.VMEM((num_heads, T, hd), jnp.bfloat16),   # V, resident
        ],
        compiler_params=pltpu.CompilerParams(
            dimension_semantics=("parallel", "arbitrary", "arbitrary")),
    )(x, wq_h, bq_h, wk_h, bk_h, wv_h, bv_h, wo_h, bo,
      cos_q, sin_q, cos_k, sin_k)


# ----------------------- pure-JAX reference (for checking) -----------------------
def _rope_ref(t, sin, cos):
    # t: (B, H, T, hd)
    hd = t.shape[-1]
    t1, t2 = t[..., :hd // 2], t[..., hd // 2:]
    sin = sin[None, None]
    cos = cos[None, None]
    return jnp.concatenate([t1 * cos - t2 * sin, t1 * sin + t2 * cos], axis=-1)


def mha_rope_ref(x, params, num_heads):
    B, T, D = x.shape
    hd = D // num_heads
    half = hd // 2
    pos = jnp.arange(T, dtype=jnp.float32)[:, None]
    inv_freq = 1.0 / (10000.0 ** (jnp.arange(half, dtype=jnp.float32) / half))
    sinusoid = pos * inv_freq[None, :]
    sin_emb, cos_emb = jnp.sin(sinusoid), jnp.cos(sinusoid)

    def proj(w, b):
        return (x @ w.T + b).reshape(B, T, num_heads, hd).transpose(0, 2, 1, 3)

    q = _rope_ref(proj(params["wq"], params["bq"]), sin_emb, cos_emb)
    k = _rope_ref(proj(params["wk"], params["bk"]), sin_emb, cos_emb)
    v = proj(params["wv"], params["bv"])
    scores = jnp.einsum("bhtd,bhsd->bhts", q, k) / math.sqrt(hd)
    attn = jax.nn.softmax(scores, axis=-1)
    ctx = jnp.einsum("bhts,bhsd->bhtd", attn, v)
    ctx = ctx.transpose(0, 2, 1, 3).reshape(B, T, D)
    return ctx @ params["wo"].T + params["bo"]


if __name__ == "__main__":
    B, T, D, H = 2, 8, 32, 4

    key = jax.random.PRNGKey(0)
    keys = jax.random.split(key, 9)
    bound = 1.0 / math.sqrt(D)   # nn.Linear default init range

    params = {
        "wq": jax.random.uniform(keys[0], (D, D), jnp.float32, -bound, bound),
        "bq": jax.random.uniform(keys[1], (D,), jnp.float32, -bound, bound),
        "wk": jax.random.uniform(keys[2], (D, D), jnp.float32, -bound, bound),
        "bk": jax.random.uniform(keys[3], (D,), jnp.float32, -bound, bound),
        "wv": jax.random.uniform(keys[4], (D, D), jnp.float32, -bound, bound),
        "bv": jax.random.uniform(keys[5], (D,), jnp.float32, -bound, bound),
        "wo": jax.random.uniform(keys[6], (D, D), jnp.float32, -bound, bound),
        "bo": jax.random.uniform(keys[7], (D,), jnp.float32, -bound, bound),
    }
    x = jax.random.normal(keys[8], (B, T, D), jnp.float32)

    out = mha_rope_pallas(x, params, H)
    out = jax.block_until_ready(out)

    ref = mha_rope_ref(x, params, H)
    assert out.shape == (B, T, D)
    # bf16 MXU operands + approximate reciprocal -> compare at bf16-level tolerance.
    assert jnp.allclose(out, ref, atol=3e-2, rtol=3e-2), "mismatch vs reference"

    print("KERNEL_OK")
</pallas_src>

<mosaic_0001>
module attributes {stable_mosaic.version = 11 : i64} {
  func.func @_mha_rope_kernel(%arg0: i32, %arg1: i32, %arg2: i32, %arg3: memref<1x8x32xf32, #tpu.memory_space<vmem>>, %arg4: memref<1x32x8xbf16, #tpu.memory_space<vmem>>, %arg5: memref<1x1x8xf32, #tpu.memory_space<vmem>>, %arg6: memref<1x32x8xbf16, #tpu.memory_space<vmem>>, %arg7: memref<1x1x8xf32, #tpu.memory_space<vmem>>, %arg8: memref<1x32x8xbf16, #tpu.memory_space<vmem>>, %arg9: memref<1x1x8xf32, #tpu.memory_space<vmem>>, %arg10: memref<1x8x32xbf16, #tpu.memory_space<vmem>>, %arg11: memref<1x32xf32, #tpu.memory_space<vmem>>, %arg12: memref<8x8xf32, #tpu.memory_space<vmem>>, %arg13: memref<8x8xf32, #tpu.memory_space<vmem>>, %arg14: memref<8x8xf32, #tpu.memory_space<vmem>>, %arg15: memref<8x8xf32, #tpu.memory_space<vmem>>, %arg16: memref<1x8x32xf32, #tpu.memory_space<vmem>>, %arg17: memref<4x8x8xbf16, #tpu.memory_space<vmem>>, %arg18: memref<4x8x8xbf16, #tpu.memory_space<vmem>>) attributes {dimension_semantics = [#tpu.dimension_semantics<parallel>, #tpu.dimension_semantics<arbitrary>, #tpu.dimension_semantics<arbitrary>], iteration_bounds = array<i64: 2, 1, 4>, scalar_prefetch = 0 : i64, scratch_operands = 2 : i64, tpu.core_type = #tpu.core_type<tc>, window_params = [{transform_indices = @transform_0, window_bounds = array<i64: 1, 8, 32>}, {transform_indices = @transform_1, window_bounds = array<i64: 1, 32, 8>}, {transform_indices = @transform_2, window_bounds = array<i64: 1, 1, 8>}, {transform_indices = @transform_3, window_bounds = array<i64: 1, 32, 8>}, {transform_indices = @transform_4, window_bounds = array<i64: 1, 1, 8>}, {transform_indices = @transform_5, window_bounds = array<i64: 1, 32, 8>}, {transform_indices = @transform_6, window_bounds = array<i64: 1, 1, 8>}, {transform_indices = @transform_7, window_bounds = array<i64: 1, 8, 32>}, {pipeline_mode = #tpu.pipeline_mode<synchronous>, transform_indices = @transform_8, window_bounds = array<i64: 1, 32>}, {transform_indices = @transform_9, window_bounds = array<i64: 8, 8>}, {transform_indices = @transform_10, window_bounds = array<i64: 8, 8>}, {pipeline_mode = #tpu.pipeline_mode<synchronous>, transform_indices = @transform_11, window_bounds = array<i64: 8, 8>}, {pipeline_mode = #tpu.pipeline_mode<synchronous>, transform_indices = @transform_12, window_bounds = array<i64: 8, 8>}, {transform_indices = @transform_13, window_bounds = array<i64: 1, 8, 32>}]} {
    %c0_i32 = arith.constant 0 : i32
    %0 = arith.cmpi eq, %arg1, %c0_i32 : i32
    %1 = arith.extui %0 : i1 to i32
    %c0_i32_0 = arith.constant 0 : i32
    %2 = arith.cmpi ne, %1, %c0_i32_0 : i32
    scf.if %2 {
      %c0_28 = arith.constant 0 : index
      %c0_29 = arith.constant 0 : index
      %c0_30 = arith.constant 0 : index
      %54 = vector.load %arg3[%c0_28, %c0_29, %c0_30] : memref<1x8x32xf32, #tpu.memory_space<vmem>>, vector<1x8x32xf32>
      %55 = vector.shape_cast %54 : vector<1x8x32xf32> to vector<8x32xf32>
      %56 = arith.truncf %55 : vector<8x32xf32> to vector<8x32xbf16>
      %c0_31 = arith.constant 0 : index
      %c0_32 = arith.constant 0 : index
      %c0_33 = arith.constant 0 : index
      %57 = vector.load %arg6[%c0_31, %c0_32, %c0_33] : memref<1x32x8xbf16, #tpu.memory_space<vmem>>, vector<1x32x8xbf16>
      %58 = vector.shape_cast %57 : vector<1x32x8xbf16> to vector<32x8xbf16>
      %cst_34 = arith.constant dense<0.000000e+00> : vector<8x8xf32>
      %59 = tpu.matmul %56, %58, %cst_34 {dimension_numbers = #tpu.dot_dimension_numbers<[1], [0], [0], [1], [0, 0, 1, 1], [], []>} : vector<8x32xbf16>, vector<32x8xbf16>, vector<8x8xf32> -> vector<8x8xf32>
      %c0_35 = arith.constant 0 : index
      %c0_36 = arith.constant 0 : index
      %c0_37 = arith.constant 0 : index
      %60 = vector.load %arg7[%c0_35, %c0_36, %c0_37] : memref<1x1x8xf32, #tpu.memory_space<vmem>>, vector<1x1x8xf32>
      %61 = vector.shape_cast %60 : vector<1x1x8xf32> to vector<1x8xf32>
      %62 = vector.broadcast %61 : vector<1x8xf32> to vector<8x8xf32>
      %63 = arith.addf %59, %62 : vector<8x8xf32>
      %c0_38 = arith.constant 0 : index
      %c0_39 = arith.constant 0 : index
      %c0_40 = arith.constant 0 : index
      %64 = vector.load %arg8[%c0_38, %c0_39, %c0_40] : memref<1x32x8xbf16, #tpu.memory_space<vmem>>, vector<1x32x8xbf16>
      %65 = vector.shape_cast %64 : vector<1x32x8xbf16> to vector<32x8xbf16>
      %cst_41 = arith.constant dense<0.000000e+00> : vector<8x8xf32>
      %66 = tpu.matmul %56, %65, %cst_41 {dimension_numbers = #tpu.dot_dimension_numbers<[1], [0], [0], [1], [0, 0, 1, 1], [], []>} : vector<8x32xbf16>, vector<32x8xbf16>, vector<8x8xf32> -> vector<8x8xf32>
      %c0_42 = arith.constant 0 : index
      %c0_43 = arith.constant 0 : index
      %c0_44 = arith.constant 0 : index
      %67 = vector.load %arg9[%c0_42, %c0_43, %c0_44] : memref<1x1x8xf32, #tpu.memory_space<vmem>>, vector<1x1x8xf32>
      %68 = vector.shape_cast %67 : vector<1x1x8xf32> to vector<1x8xf32>
      %69 = vector.broadcast %68 : vector<1x8xf32> to vector<8x8xf32>
      %70 = arith.addf %66, %69 : vector<8x8xf32>
      %c0_45 = arith.constant 0 : index
      %c0_46 = arith.constant 0 : index
      %71 = vector.load %arg14[%c0_45, %c0_46] : memref<8x8xf32, #tpu.memory_space<vmem>>, vector<8x8xf32>
      %72 = arith.mulf %63, %71 : vector<8x8xf32>
      %73 = vector.extract_strided_slice %63 {offsets = [0, 4], sizes = [8, 4], strides = [1, 1]} : vector<8x8xf32> to vector<8x4xf32>
      %74 = vector.extract_strided_slice %63 {offsets = [0, 0], sizes = [8, 4], strides = [1, 1]} : vector<8x8xf32> to vector<8x4xf32>
      %75 = tpu.concatenate %73, %74 in 1 : vector<8x4xf32>, vector<8x4xf32> -> vector<8x8xf32>
      %c0_47 = arith.constant 0 : index
      %c0_48 = arith.constant 0 : index
      %76 = vector.load %arg15[%c0_47, %c0_48] : memref<8x8xf32, #tpu.memory_space<vmem>>, vector<8x8xf32>
      %77 = arith.mulf %75, %76 : vector<8x8xf32>
      %78 = arith.addf %72, %77 : vector<8x8xf32>
      %79 = arith.truncf %78 : vector<8x8xf32> to vector<8x8xbf16>
      %80 = arith.index_cast %arg2 : i32 to index
      %c0_49 = arith.constant 0 : index
      %c0_50 = arith.constant 0 : index
      %81 = vector.load %arg17[%80, %c0_49, %c0_50] : memref<4x8x8xbf16, #tpu.memory_space<vmem>>, vector<1x8x8xbf16>
      %82 = vector.shape_cast %81 : vector<1x8x8xbf16> to vector<8x8xbf16>
      %83 = vector.shape_cast %79 : vector<8x8xbf16> to vector<1x8x8xbf16>
      tpu.vector_store %arg17[%80, %c0_49, %c0_50], %83 {strides = array<i32>} : memref<4x8x8xbf16, #tpu.memory_space<vmem>>, vector<1x8x8xbf16>,
      %84 = arith.truncf %70 : vector<8x8xf32> to vector<8x8xbf16>
      %85 = arith.index_cast %arg2 : i32 to index
      %c0_51 = arith.constant 0 : index
      %c0_52 = arith.constant 0 : index
      %86 = vector.load %arg18[%85, %c0_51, %c0_52] : memref<4x8x8xbf16, #tpu.memory_space<vmem>>, vector<1x8x8xbf16>
      %87 = vector.shape_cast %86 : vector<1x8x8xbf16> to vector<8x8xbf16>
      %88 = vector.shape_cast %84 : vector<8x8xbf16> to vector<1x8x8xbf16>
      tpu.vector_store %arg18[%85, %c0_51, %c0_52], %88 {strides = array<i32>} : memref<4x8x8xbf16, #tpu.memory_space<vmem>>, vector<1x8x8xbf16>,
    } else {
    }
    %c8_i32 = arith.constant 8 : i32
    %3 = arith.muli %arg1, %c8_i32 : i32
    %4 = tpu.assume_multiple %3, 8 : i32
    %c0 = arith.constant 0 : index
    %5 = arith.index_cast %4 : i32 to index
    %c0_1 = arith.constant 0 : index
    %6 = vector.load %arg3[%c0, %5, %c0_1] : memref<1x8x32xf32, #tpu.memory_space<vmem>>, vector<1x8x32xf32>
    %7 = vector.shape_cast %6 : vector<1x8x32xf32> to vector<8x32xf32>
    %8 = arith.truncf %7 : vector<8x32xf32> to vector<8x32xbf16>
    %c0_2 = arith.constant 0 : index
    %c0_3 = arith.constant 0 : index
    %c0_4 = arith.constant 0 : index
    %9 = vector.load %arg4[%c0_2, %c0_3, %c0_4] : memref<1x32x8xbf16, #tpu.memory_space<vmem>>, vector<1x32x8xbf16>
    %10 = vector.shape_cast %9 : vector<1x32x8xbf16> to vector<32x8xbf16>
    %cst = arith.constant dense<0.000000e+00> : vector<8x8xf32>
    %11 = tpu.matmul %8, %10, %cst {dimension_numbers = #tpu.dot_dimension_numbers<[1], [0], [0], [1], [0, 0, 1, 1], [], []>} : vector<8x32xbf16>, vector<32x8xbf16>, vector<8x8xf32> -> vector<8x8xf32>
    %c0_5 = arith.constant 0 : index
    %c0_6 = arith.constant 0 : index
    %c0_7 = arith.constant 0 : index
    %12 = vector.load %arg5[%c0_5, %c0_6, %c0_7] : memref<1x1x8xf32, #tpu.memory_space<vmem>>, vector<1x1x8xf32>
    %13 = vector.shape_cast %12 : vector<1x1x8xf32> to vector<1x8xf32>
    %14 = vector.broadcast %13 : vector<1x8xf32> to vector<8x8xf32>
    %15 = arith.addf %11, %14 : vector<8x8xf32>
    %c0_8 = arith.constant 0 : index
    %c0_9 = arith.constant 0 : index
    %16 = vector.load %arg12[%c0_8, %c0_9] : memref<8x8xf32, #tpu.memory_space<vmem>>, vector<8x8xf32>
    %17 = arith.mulf %15, %16 : vector<8x8xf32>
    %18 = vector.extract_strided_slice %15 {offsets = [0, 4], sizes = [8, 4], strides = [1, 1]} : vector<8x8xf32> to vector<8x4xf32>
    %19 = vector.extract_strided_slice %15 {offsets = [0, 0], sizes = [8, 4], strides = [1, 1]} : vector<8x8xf32> to vector<8x4xf32>
    %20 = tpu.concatenate %18, %19 in 1 : vector<8x4xf32>, vector<8x4xf32> -> vector<8x8xf32>
    %c0_10 = arith.constant 0 : index
    %c0_11 = arith.constant 0 : index
    %21 = vector.load %arg13[%c0_10, %c0_11] : memref<8x8xf32, #tpu.memory_space<vmem>>, vector<8x8xf32>
    %22 = arith.mulf %20, %21 : vector<8x8xf32>
    %23 = arith.addf %17, %22 : vector<8x8xf32>
    %24 = arith.truncf %23 : vector<8x8xf32> to vector<8x8xbf16>
    %25 = arith.index_cast %arg2 : i32 to index
    %c0_12 = arith.constant 0 : index
    %c0_13 = arith.constant 0 : index
    %26 = vector.load %arg17[%25, %c0_12, %c0_13] : memref<4x8x8xbf16, #tpu.memory_space<vmem>>, vector<1x8x8xbf16>
    %27 = vector.shape_cast %26 : vector<1x8x8xbf16> to vector<8x8xbf16>
    %cst_14 = arith.constant dense<0.000000e+00> : vector<8x8xf32>
    %28 = tpu.matmul %24, %27, %cst_14 {dimension_numbers = #tpu.dot_dimension_numbers<[1], [1], [0], [0], [0, 0, 1, 0], [], []>} : vector<8x8xbf16>, vector<8x8xbf16>, vector<8x8xf32> -> vector<8x8xf32>
    %cst_15 = arith.constant dense<0xFF800000> : vector<8xf32>
    %29 = vector.multi_reduction <maximumf>, %28, %cst_15 [1] : vector<8x8xf32> to vector<8xf32>
    %30 = vector.shape_cast %29 : vector<8xf32> to vector<8x1xf32>
    %31 = vector.broadcast %30 : vector<8x1xf32> to vector<8x8xf32>
    %32 = arith.subf %28, %31 : vector<8x8xf32>
    %33 = math.exp %32 : vector<8x8xf32>
    %cst_16 = arith.constant dense<0.000000e+00> : vector<8xf32>
    %34 = vector.multi_reduction <add>, %33, %cst_16 [1] : vector<8x8xf32> to vector<8xf32>
    %35 = vector.shape_cast %34 : vector<8xf32> to vector<8x1xf32>
    %36 = tpu.reciprocal %35 {approx = true} : vector<8x1xf32> -> vector<8x1xf32>
    %37 = vector.broadcast %36 : vector<8x1xf32> to vector<8x8xf32>
    %38 = arith.mulf %33, %37 : vector<8x8xf32>
    %39 = arith.truncf %38 : vector<8x8xf32> to vector<8x8xbf16>
    %40 = arith.index_cast %arg2 : i32 to index
    %c0_17 = arith.constant 0 : index
    %c0_18 = arith.constant 0 : index
    %41 = vector.load %arg18[%40, %c0_17, %c0_18] : memref<4x8x8xbf16, #tpu.memory_space<vmem>>, vector<1x8x8xbf16>
    %42 = vector.shape_cast %41 : vector<1x8x8xbf16> to vector<8x8xbf16>
    %cst_19 = arith.constant dense<0.000000e+00> : vector<8x8xf32>
    %43 = tpu.matmul %39, %42, %cst_19 {dimension_numbers = #tpu.dot_dimension_numbers<[1], [0], [0], [1], [0, 0, 1, 1], [], []>} : vector<8x8xbf16>, vector<8x8xbf16>, vector<8x8xf32> -> vector<8x8xf32>
    %44 = arith.truncf %43 : vector<8x8xf32> to vector<8x8xbf16>
    %c0_20 = arith.constant 0 : index
    %c0_21 = arith.constant 0 : index
    %c0_22 = arith.constant 0 : index
    %45 = vector.load %arg10[%c0_20, %c0_21, %c0_22] : memref<1x8x32xbf16, #tpu.memory_space<vmem>>, vector<1x8x32xbf16>
    %46 = vector.shape_cast %45 : vector<1x8x32xbf16> to vector<8x32xbf16>
    %cst_23 = arith.constant dense<0.000000e+00> : vector<8x32xf32>
    %47 = tpu.matmul %44, %46, %cst_23 {dimension_numbers = #tpu.dot_dimension_numbers<[1], [0], [0], [1], [0, 0, 1, 1], [], []>} : vector<8x8xbf16>, vector<8x32xbf16>, vector<8x32xf32> -> vector<8x32xf32>
    %c0_i32_24 = arith.constant 0 : i32
    %48 = arith.cmpi eq, %arg2, %c0_i32_24 : i32
    %49 = arith.extui %48 : i1 to i32
    %c0_i32_25 = arith.constant 0 : i32
    %50 = arith.cmpi ne, %49, %c0_i32_25 : i32
    scf.if %50 {
      %c0_28 = arith.constant 0 : index
      %c0_29 = arith.constant 0 : index
      %54 = vector.load %arg11[%c0_28, %c0_29] : memref<1x32xf32, #tpu.memory_space<vmem>>, vector<1x32xf32>
      %55 = vector.broadcast %54 : vector<1x32xf32> to vector<8x32xf32>
      %56 = arith.addf %47, %55 : vector<8x32xf32>
      %c0_30 = arith.constant 0 : index
      %c0_31 = arith.constant 0 : index
      %c0_32 = arith.constant 0 : index
      %57 = vector.load %arg16[%c0_30, %c0_31, %c0_32] : memref<1x8x32xf32, #tpu.memory_space<vmem>>, vector<1x8x32xf32>
      %58 = vector.shape_cast %57 : vector<1x8x32xf32> to vector<8x32xf32>
      %59 = vector.shape_cast %56 : vector<8x32xf32> to vector<1x8x32xf32>
      tpu.vector_store %arg16[%c0_30, %c0_31, %c0_32], %59 {strides = array<i32>} : memref<1x8x32xf32, #tpu.memory_space<vmem>>, vector<1x8x32xf32>,
    } else {
    }
    %c0_i32_26 = arith.constant 0 : i32
    %51 = arith.cmpi ne, %arg2, %c0_i32_26 : i32
    %52 = arith.extui %51 : i1 to i32
    %c0_i32_27 = arith.constant 0 : i32
    %53 = arith.cmpi ne, %52, %c0_i32_27 : i32
    scf.if %53 {
      %c0_28 = arith.constant 0 : index
      %c0_29 = arith.constant 0 : index
      %c0_30 = arith.constant 0 : index
      %54 = vector.load %arg16[%c0_28, %c0_29, %c0_30] : memref<1x8x32xf32, #tpu.memory_space<vmem>>, vector<1x8x32xf32>
      %55 = vector.shape_cast %54 : vector<1x8x32xf32> to vector<8x32xf32>
      %56 = arith.addf %55, %47 : vector<8x32xf32>
      %c0_31 = arith.constant 0 : index
      %c0_32 = arith.constant 0 : index
      %c0_33 = arith.constant 0 : index
      %57 = vector.load %arg16[%c0_31, %c0_32, %c0_33] : memref<1x8x32xf32, #tpu.memory_space<vmem>>, vector<1x8x32xf32>
      %58 = vector.shape_cast %57 : vector<1x8x32xf32> to vector<8x32xf32>
      %59 = vector.shape_cast %56 : vector<8x32xf32> to vector<1x8x32xf32>
      tpu.vector_store %arg16[%c0_31, %c0_32, %c0_33], %59 {strides = array<i32>} : memref<1x8x32xf32, #tpu.memory_space<vmem>>, vector<1x8x32xf32>,
    } else {
    }
    return
  }
  func.func @transform_0(%arg0: i32, %arg1: i32, %arg2: i32) -> (i32, i32, i32) {
    %c0_i32 = arith.constant 0 : i32
    %c0_i32_0 = arith.constant 0 : i32
    %c0_i32_1 = arith.constant 0 : i32
    return %arg0, %c0_i32, %c0_i32_0 : i32, i32, i32
  }
  func.func @transform_1(%arg0: i32, %arg1: i32, %arg2: i32) -> (i32, i32, i32) {
    %c0_i32 = arith.constant 0 : i32
    %c0_i32_0 = arith.constant 0 : i32
    %c0_i32_1 = arith.constant 0 : i32
    return %arg2, %c0_i32, %c0_i32_0 : i32, i32, i32
  }
  func.func @transform_2(%arg0: i32, %arg1: i32, %arg2: i32) -> (i32, i32, i32) {
    %c0_i32 = arith.constant 0 : i32
    %c0_i32_0 = arith.constant 0 : i32
    %c0_i32_1 = arith.constant 0 : i32
    return %arg2, %c0_i32, %c0_i32_0 : i32, i32, i32
  }
  func.func @transform_3(%arg0: i32, %arg1: i32, %arg2: i32) -> (i32, i32, i32) {
    %c0_i32 = arith.constant 0 : i32
    %c0_i32_0 = arith.constant 0 : i32
    %c0_i32_1 = arith.constant 0 : i32
    return %arg2, %c0_i32, %c0_i32_0 : i32, i32, i32
  }
  func.func @transform_4(%arg0: i32, %arg1: i32, %arg2: i32) -> (i32, i32, i32) {
    %c0_i32 = arith.constant 0 : i32
    %c0_i32_0 = arith.constant 0 : i32
    %c0_i32_1 = arith.constant 0 : i32
    return %arg2, %c0_i32, %c0_i32_0 : i32, i32, i32
  }
  func.func @transform_5(%arg0: i32, %arg1: i32, %arg2: i32) -> (i32, i32, i32) {
    %c0_i32 = arith.constant 0 : i32
    %c0_i32_0 = arith.constant 0 : i32
    %c0_i32_1 = arith.constant 0 : i32
    return %arg2, %c0_i32, %c0_i32_0 : i32, i32, i32
  }
  func.func @transform_6(%arg0: i32, %arg1: i32, %arg2: i32) -> (i32, i32, i32) {
    %c0_i32 = arith.constant 0 : i32
    %c0_i32_0 = arith.constant 0 : i32
    %c0_i32_1 = arith.constant 0 : i32
    return %arg2, %c0_i32, %c0_i32_0 : i32, i32, i32
  }
  func.func @transform_7(%arg0: i32, %arg1: i32, %arg2: i32) -> (i32, i32, i32) {
    %c0_i32 = arith.constant 0 : i32
    %c0_i32_0 = arith.constant 0 : i32
    %c0_i32_1 = arith.constant 0 : i32
    return %arg2, %c0_i32, %c0_i32_0 : i32, i32, i32
  }
  func.func @transform_8(%arg0: i32, %arg1: i32, %arg2: i32) -> (i32, i32) {
    %c0_i32 = arith.constant 0 : i32
    %c0_i32_0 = arith.constant 0 : i32
    %c0_i32_1 = arith.constant 0 : i32
    return %c0_i32, %c0_i32_0 : i32, i32
  }
  func.func @transform_9(%arg0: i32, %arg1: i32, %arg2: i32) -> (i32, i32) {
    %c0_i32 = arith.constant 0 : i32
    %c0_i32_0 = arith.constant 0 : i32
    return %arg1, %c0_i32 : i32, i32
  }
  func.func @transform_10(%arg0: i32, %arg1: i32, %arg2: i32) -> (i32, i32) {
    %c0_i32 = arith.constant 0 : i32
    %c0_i32_0 = arith.constant 0 : i32
    return %arg1, %c0_i32 : i32, i32
  }
  func.func @transform_11(%arg0: i32, %arg1: i32, %arg2: i32) -> (i32, i32) {
    %c0_i32 = arith.constant 0 : i32
    %c0_i32_0 = arith.constant 0 : i32
    %c0_i32_1 = arith.constant 0 : i32
    return %c0_i32, %c0_i32_0 : i32, i32
  }
  func.func @transform_12(%arg0: i32, %arg1: i32, %arg2: i32) -> (i32, i32) {
    %c0_i32 = arith.constant 0 : i32
    %c0_i32_0 = arith.constant 0 : i32
    %c0_i32_1 = arith.constant 0 : i32
    return %c0_i32, %c0_i32_0 : i32, i32
  }
  func.func @transform_13(%arg0: i32, %arg1: i32, %arg2: i32) -> (i32, i32, i32) {
    %c0_i32 = arith.constant 0 : i32
    %c0_i32_0 = arith.constant 0 : i32
    return %arg0, %arg1, %c0_i32 : i32, i32, i32
  }
}

</mosaic_0001>

<bundles_post_ra>
// kernel: tpu_custom_call.1
= control target key start
LH: loop header
LB: loop body
LE: loop exit
PB: predicated region body
PF: predicated region fallthrough
CT: control target
= control target key end

     0   :  { %s1808_s0 = inlined_call_operand.vmem [shape: f32[2,8,32], index: 0, kind: input, shape index: {}]   ;;  %s1809_s1 = inlined_call_operand.vmem [shape: bf16[4,32,8], index: 1, kind: input, shape index: {}]   ;;  %s1810_s2 = inlined_call_operand.vmem [shape: f32[4,1,8], index: 2, kind: input, shape index: {}]   ;;  %s1811_s3 = inlined_call_operand.vmem [shape: bf16[4,32,8], index: 3, kind: input, shape index: {}]   ;;  %s1812_s4 = inlined_call_operand.vmem [shape: f32[4,1,8], index: 4, kind: input, shape index: {}]   ;;  %s1813_s5 = inlined_call_operand.vmem [shape: bf16[4,32,8], index: 5, kind: input, shape index: {}]   ;;  %s1814_s6 = inlined_call_operand.vmem [shape: f32[4,1,8], index: 6, kind: input, shape index: {}]   ;;  %s1815_s7 = inlined_call_operand.vmem [shape: bf16[4,8,32], index: 7, kind: input, shape index: {}]   ;;  %s1816_s8 = inlined_call_operand.vmem [shape: f32[1,32], index: 8, kind: input, shape index: {}]   ;;  %s1817_s9 = inlined_call_operand.vmem [shape: f32[8,8], index: 9, kind: input, shape index: {}]   ;;  %s1818_s10 = inlined_call_operand.vmem [shape: f32[8,8], index: 10, kind: input, shape index: {}]   ;;  %s1819_s11 = inlined_call_operand.vmem [shape: f32[8,8], index: 11, kind: input, shape index: {}]   ;;  %s1820_s12 = inlined_call_operand.vmem [shape: f32[8,8], index: 12, kind: input, shape index: {}]   ;;  %s1821_s13 = inlined_call_operand.hbm [shape: f32[2,8,32], index: 13, kind: output, shape index: {}]  }
   0x1   :  { %1832 = sst [smem:[#allocation16_spill]] %s1821_s13 }
   0x2   :  { %18 = vsyncpa [#allocation5], 0 }
   0x3   :  { %20 = vsyncpa [#allocation5 + $0x1], 0  ;;  %s1596_s25 = smov 0   ;;  %s1598_s26 = smov 0  }
   0x4   :  { %s1600_s27 = smov 0   ;;  %s1602_s28 = smov 0  }
   0x5   :  { %s1604_s29 = smov 0   ;;  %s1606_s30 = smov 0  }
   0x6   :  { %s1608_s14 = smov 0   ;;  %s1610_s15 = smov 0  }
   0x7 LB: > { %1833 = sst [smem:[#allocation7_spill]] %s1491_s25  ;;  %s1240_s16 = sadd.s32 4294967295, %s1519_s15   ;;  %s1519_s15 = sphi %s1610_s15, %s26_s15   ;;  %s1515_s14 = sphi %s1608_s14, %s1857_s14   ;;  %s1511_s30 = sphi %s1606_s30, %s1853_s30   ;;  %s1507_s29 = sphi %s1604_s29, %s1852_s29   ;;  %s1503_s28 = sphi %s1602_s28, %s1851_s28   ;;  %s1499_s27 = sphi %s1600_s27, %s1850_s27   ;;  %s1495_s26 = sphi %s1598_s26, %s1856_s26   ;;  %s1491_s25 = sphi %s1596_s25, %s1855_s25  }
   0x8   : > { %1834 = sst [smem:[#allocation8_spill]] %s1499_s27  ;;  %s1241_s17 = sadd.s32 4294967294, %s1519_s15  }
   0x9   : > { %1835 = sst [smem:[#allocation9_spill]] %s1511_s30  ;;  %s38_s18 = sadd.s32 1, %s1511_s30 }
   0xa   : > { %1836 = sst [smem:[#allocation10_spill]] %s1515_s14  ;;  %p39_p0 = scmp.ge.s32.totalorder %s38_s18, 4 }
   0xb   : > { %1837 = sst [smem:[#allocation11_spill]] %s1519_s15  ;;  %s45_s19 = sadd.s32 1, %s1515_s14 }
   0xc   : > { %p387_p1 = scmp.ne.s32.totalorder %s1499_s27, %s1495_s26  ;;  %p388_p2 = scmp.eq.s32.totalorder %s1240_s16, 7 }
   0xd   : > { %s1859_s18 = smov (%p39_p0, %s38_s18), 0  ;;  %s1861_s19 = smov (!%p39_p0, %s45_s19), %s1515_s14 }
   0xe   : > { %1838 = sst [smem:[#allocation12_spill]] %s1859_s18  ;;  %p1645_p3 = por %p388_p2, %p387_p1 }
   0xf   : > { %p393_p4 = scmp.ne.s32.totalorder %s1495_s26, %s1491_s25  ;;  %p47_p5 = scmp.ge.s32.totalorder %s1861_s19, 2 }
  0x10   : > { %p394_p6 = scmp.eq.s32.totalorder %s1241_s17, 7  ;;  %p1246_p7 = scmp.ge.s32.totalorder %s1519_s15, 1 }
  0x11   : > { %p491_p8 = scmp.lt.s32.totalorder %s1519_s15, 9  ;;  %s1863_s19 = smov (%p47_p5, %s1861_s19), 0 }
  0x12   : > { %1840 = sst [smem:[#allocation13_spill]] %s1863_s19  ;;  %p1655_p9 = por %p394_p6, %p393_p4 }
  0x13   : > { %p492_p10 = pnand %p1246_p7, %p491_p8  ;;  %s372_s22 = ssub.s32 %s1515_s14, %s1863_s19 }
  0x14   : > { %s1841_s21 = scalar_select %p1655_p9, 1, 0 }
  0x15   : > { %s377_s23 = sadd.s32 1, %s1499_s27  ;;  %p375_p11 = scmp.eq.s32.totalorder %s372_s22, 0 }
  0x16   : > { %1842 = sst [smem:[#allocation14_spill]] %s1841_s21  ;;  %495 = sbr.rel (%p492_p10) target bundleno = 1317 (0x525), region = 72 }
  0x17   : > { %s1663_s24 = scalar_select %p375_p11, %s1499_s27, %s377_s23  }
  0x18   : > { %s1823_s16 = sand.u32 (!%p492_p10), 1, %s1495_s26   ;;  %p574_p12 = scmp.lt.s32.totalorder (!%p492_p10), %s1503_s28, 3 }
  0x19   : > { %1843 = sst [smem:[#allocation15_spill]] %s1663_s24  ;;  %s1669_s17 = sshll.u32 (!%p492_p10), %s1823_s16, 3 }
  0x1a   : > { %p570_p13 = scmp.lt.s32.totalorder (!%p492_p10), %s1507_s29, 1  ;;  %s1523_s18 = smov (!%p492_p10), 124  }
  0x1b   : > { %v1521_v0 = vmov 0.0   ;;  %vm1522_vm0 = vmmov 0   ;;  %s1679_s22 = scalar_select %p574_p12, %s1503_s28, 3  ;;  %vm640_vm1 = vcmask 261120   ;;  %vm756_vm2 = vcmask 31744   ;;  %v747_v22 = vld [vmem:[%s1819_s11] sm:$0xff] }
  0x1c   : > { %1300 = vmatprep.subr.bf16.mxu0 %v1521_v0  ;;  %1304 = vmatprep.mubr.msk.bf16.mxu0 %vm1522_vm0, %v1521_v0  ;;  %s571_s23 = scalar_select %p570_p13, %s1507_s29, 1  ;;  %v758_v23 = vld [vmem:[%s1820_s12] sm:$0xff]  ;;  %vm764_vm3 = vcmask 60416   ;;  %vm859_vm4 = vcmask 64512   ;;  %vm924_vm5 = vcmask 1043456  }
  0x1d   : > { %1308 = vmatprep.subr.bf16.mxu1 %v1521_v0  ;;  %1312 = vmatprep.mubr.msk.bf16.mxu1 %vm1522_vm0, %v1521_v0  ;;  %s1282_s19 = sshll.u32 %s1679_s22, 4  ;;  %s589_s15 = scalar_lea.vmem %s1812_s4, %s1679_s22  ;;  %v852_v32 = vld [vmem:[%s1818_s10] sm:$0xff] }
  0x1e   : > { %s586_s14 = scalar_lea.vmem %s1811_s3, %s1282_s19  ;;  %s1248_s30 = sshll.u32 %s571_s23, 3  ;;  %v1256_v8 = vld [vmem:[%s589_s15] ss:$0 sm:$0xff] }
  0x1f   : > { %v1417_v1 = vld [vmem:[%s586_s14 + $0x8] sm:$0xff]   ;;  %s578_s21 = scalar_lea.vmem %s1809_s1, %s1282_s19  ;;  %v1418_v2 = vld [vmem:[%s586_s14] sm:$0xff]   ;;  %s573_s13 = scalar_lea.vmem %s1808_s0, %s1248_s30 }
  0x20   : > { %1301 = vmatpush3.bf16.msra.mxu0 %v1417_v1  ;;  %v615_v3 = vld [vmem:[%s573_s13] sm:$0xff]  ;;  %v1419_v5 = vld [vmem:[%s578_s21 + $0x8] sm:$0xff]   ;;  %s594_s27 = scalar_lea.vmem %s1813_s5, %s1282_s19  ;;  %s581_s24 = scalar_lea.vmem %s1810_s2, %s1679_s22 }
  0x21   : > { %1302 = vmatprep.subr.bf16.mxu0 %v1521_v0  ;;  %v616_v4 = vpack.c.bf16 %v615_v3, %v615_v3  ;;  %v1420_v6 = vld [vmem:[%s578_s21] sm:$0xff]   ;;  %v1421_v7 = vld [vmem:[%s594_s27 + $0x8] sm:$0xff]   ;;  %s1524_s16 = smov 4   ;;  %s1264_s30 = sshll.u32 %s1503_s28, 2 }
  0x22   : > { %1309 = vmatpush3.bf16.msra.mxu1 %v1421_v7  ;;  %v1422_v9 = vld [vmem:[%s594_s27] sm:$0xff]   ;;  %s763_s14 = scalar_lea.vmem [#allocation2], %s1264_s30  ;;  %s597_s23 = scalar_lea.vmem %s1814_s6, %s1679_s22 }
  0x23   : > { %1310 = vmatprep.subr.bf16.mxu1 %v1521_v0  ;;  %v1266_v15 = vld [vmem:[%s581_s24] ss:$0 sm:$0xff]  ;;  %s768_s13 = scalar_lea.vmem [#allocation3], %s1264_s30  ;;  %s1255_s25 = sshll.u32 %s1679_s22, 2 }
  0x24   : > { %1303 = vmatpush3.bf16.msra.mxu0 %v1418_v2  ;;  %v841_v34 = vld [vmem:[%s1817_s9] sm:$0xff]  ;;  %s569_s22 = scalar_lea.vmem [#allocation4], %s1669_s17  ;;  %p1275_p0 = scmp.ne.s32.totalorder %s1503_s28, 0 }
  0x25   : > { %1316 = vmatprep.subr.bf16.mxu0 %v1521_v0  ;;  %v1260_v41 = vld [vmem:[%s597_s23] ss:$0 sm:$0xff] }
  0x26   : > { %1311 = vmatpush3.bf16.msra.mxu1 %v1422_v9 }
  0x27   : > { %1305 = vmatmul.mubr.msk.bf16.vlgmr.msra.gmra.mxu0 %vm640_vm1, %v616_v4  ;;  %1324 = vmatprep.subr.bf16.mxu1 %v1521_v0 }
  0x28   : > { %1317 = vmatpush3.bf16.msra.mxu0 %v1419_v5  ;;  %1320 = vmatprep.mubr.msk.bf16.mxu0 %vm1522_vm0, %v1521_v0 }
  0x29   : > { %1318 = vmatprep.subr.bf16.mxu0 %v1521_v0  ;;  %1313 = vmatmul.mubr.msk.bf16.vlgmr.msra.gmra.mxu1 %vm640_vm1, %v616_v4 }
  0x2a   : > { %1326 = vmatprep.mubr.msk.bf16.mxu1 %vm1522_vm0, %v1521_v0 }
  0x2c   : > { %1319 = vmatpush3.bf16.msra.mxu0 %v1420_v6 }
  0x2d   : > { %1330 = vmatprep.subr.bf16.mxu0 %v1521_v0 }
  0x2f   : > { %1321 = vmatmul.mubr.msk.bf16.vlgmr.msra.gmra.mxu0 %vm640_vm1, %v616_v4 }
  0x30   : > { %1332 = vmatprep.mubr.msk.bf16.mxu0 %vm1522_vm0, %v1521_v0 }
  0xe7   : > { %v678_v10 = vpop.f32.mrf.mxu0 }
  0xe8   : > { %v679_v11 = vadd.f32 %v1256_v8, %v678_v10 }
  0xe9   : > { %v1306_v12 = vpop.f32.mrf.mxu0  ;;  %v741_v42 = vpop.f32.mrf.mxu1 }
  0xea   : > { %750 = vrot.lane.b32.xlu0 %v679_v11, %s1523_s18  ;;  %v748_v26 = vmul.f32 %v747_v22, %v679_v11  ;;  %v742_v43 = vadd.f32 %v1260_v41, %v741_v42 }
  0xeb   : > { %v681_v13 = vpop.f32.mrf.mxu0  ;;  %v1314_v44 = vpop.f32.mrf.mxu1 }
  0xec   : > { %v766_v45 = vpack.c.bf16 %v742_v43, %v742_v43 }
  0xed   : > { %v1307_v14 = vpop.f32.mrf.mxu0  ;;  %v744_v46 = vpop.f32.mrf.mxu1 }
  0xee   : > { %753 = vrot.lane.b32.xlu0 %v679_v11, %s1524_s16  ;;  %769 = vst.msk [vmem:[%s768_s13] sm:$0xf] %vm764_vm3, %v766_v45 }
  0xef   : > { %v835_v16 = vpop.f32.mrf.mxu0  ;;  %v1315_v47 = vpop.f32.mrf.mxu1 }
  0xf0   : > { %v836_v17 = vadd.f32 %v1266_v15, %v835_v16 }
  0xf1   : > { %v1322_v18 = vpop.f32.mrf.mxu0 }
  0xf2   : > { %844 = vrot.lane.b32.xlu1 %v836_v17, %s1523_s18  ;;  %v842_v37 = vmul.f32 %v841_v34, %v836_v17 }
  0xf3   : > { %v838_v19 = vpop.f32.mrf.mxu0 }
  0xf5   : > { %v1323_v20 = vpop.f32.mrf.mxu0  ;;  %v920_v48 = vld [vmem:[%s768_s13] sm:$0xf] }
  0xf6   : > { %847 = vrot.lane.b32.xlu1 %v836_v17, %s1524_s16  ;;  %v926_v49 = vsel %vm924_vm5, %v920_v48, 0 }
  0xf7   : > { %1331 = vmatpush3.bf16.msra.mxu0 %v926_v49 }
 0x15c   : > { %v751_v21 = vpop.permute.xlu0 %750 }
 0x160   : > { %v754_v24 = vpop.permute.xlu0 %753 }
 0x161   : > { %v757_v25 = vsel %vm756_vm2, %v751_v21, %v754_v24 }
 0x162   : > { %v759_v27 = vmul.f32 %v758_v23, %v757_v25 }
 0x164   : > { %v760_v28 = vadd.f32 %v759_v27, %v748_v26  ;;  %v845_v29 = vpop.permute.xlu1 %844 }
 0x166   : > { %v761_v30 = vpack.c.bf16 %v760_v28, %v760_v28 }
 0x168   : > { %v848_v31 = vpop.permute.xlu1 %847  ;;  %765 = vst.msk [vmem:[%s763_s14] sm:$0xf] %vm764_vm3, %v761_v30 }
 0x169   : > { %v851_v33 = vsel %vm756_vm2, %v845_v29, %v848_v31 }
 0x16a   : > { %v853_v35 = vmul.f32 %v852_v32, %v851_v33 }
 0x16c   : > { %v854_v39 = vadd.f32 %v853_v35, %v842_v37 }
 0x16e   : > { %v855_v40 = vpack.c.bf16 %v854_v39, %v854_v39 }
 0x16f   : > { %v858_v36 = vld [vmem:[%s763_s14] sm:$0xf]  ;;  %s601_s14 = scalar_lea.vmem %s1815_s7, %s1255_s25 }
 0x170   : > { %v864_v38 = vsel %vm859_vm4, %v858_v36, 0  ;;  %v969_v60 = vld [vmem:[%s601_s14] sm:$0xf] }
 0x171   : > { %1325 = vmatpush3.bf16.xpose.msra.mxu1 %v864_v38  ;;  %v974_v61 = vsel %vm924_vm5, %v969_v60, 0 }
 0x172   : > { %1336 = vmatprep.subr.bf16.mxu1 %v1521_v0 }
 0x178   : > { %1327 = vmatmul.mubr.msk.bf16.vlgmr.msra.gmra.mxu1 %vm859_vm4, %v855_v40 }
 0x179   : > { %1338 = vmatprep.mubr.msk.bf16.mxu1 %vm1522_vm0, %v1521_v0  ;;  %1337 = vmatpush3.bf16.msra.mxu1 %v974_v61 }
 0x238   : > { %v900_v50 = vpop.f32.mrf.mxu1 }
 0x239   : > { %v906_v51 = vsel %vm859_vm4, %v900_v50, -inf }
 0x23a   : > { %907 = vmax.xlane.f32.xlu0 %v906_v51  ;;  %v1328_v52 = vpop.f32.mrf.mxu1 }
 0x23c   : > { %v903_v53 = vpop.f32.mrf.mxu1 }
 0x23e   : > { %v1329_v54 = vpop.f32.mrf.mxu1 }
 0x2c3   : > { %v908_v55 = vpop.xlane.xlu0 %907 }
 0x2c4   : > { %v909_v56 = vsub.f32 %v900_v50, %v908_v55 }
 0x2c6   : > { %v910_v57 = vmul.f32 1.442695, %v909_v56 }
 0x2c8   : > { %1423 = vpow2.f32 %v910_v57 }
 0x2d5   : > { %v1424_v58 = vpop.eup %1423 }
 0x2d6   : > { %v912_v59 = vsel %vm859_vm4, %v1424_v58, 0.0 }
 0x2d7   : > { %913 = vadd.xlane.f32.xlu1 %v912_v59 }
 0x360   : > { %v914_v62 = vpop.xlane.xlu1 %913 }
 0x361   : > { %1425 = vrcp.f32 %v914_v62 }
 0x36e   : > { %v1426_v63 = vpop.eup %1425 }
 0x36f   : > { %v916_v0 = vmul.f32 %v1426_v63, %v1424_v58 }
 0x371   : > { %v917_v1 = vpack.c.bf16 %v916_v0, %v916_v0 }
 0x373   : > { %1333 = vmatmul.mubr.msk.bf16.vlgmr.msra.gmra.mxu0 %vm859_vm4, %v917_v1 }
 0x433   : > { %v962_v2 = vpop.f32.mrf.mxu0 }
 0x434   : > { %v968_v3 = vpack.c.bf16 %v962_v2, %v962_v2 }
 0x435   : > { %v1334_v4 = vpop.f32.mrf.mxu0 }
 0x436   : > { %1339 = vmatmul.mubr.msk.bf16.vlgmr.msra.gmra.mxu1 %vm859_vm4, %v968_v3 }
 0x437   : > { %v965_v5 = vpop.f32.mrf.mxu0 }
 0x439   : > { %v1335_v6 = vpop.f32.mrf.mxu0 }
 0x4f6   : > { %v1010_v7 = vpop.f32.mrf.mxu1 }
 0x4f8   : > { %v1340_v8 = vpop.f32.mrf.mxu1  ;;  %1019 = sbr.rel (%p1275_p0) target bundleno = 1281 (0x501), region = 80 }
 0x4fa   : > { %v1013_v9 = vpop.f32.mrf.mxu1 }
 0x4fc   : > { %v1341_v10 = vpop.f32.mrf.mxu1 }
 0x4fd   : > { %v1276_v11 = vld [vmem:[%s1816_s8] ss:$0 sm:$0xff] }
 0x4fe   : > { %v1027_v12 = vadd.f32 %v1276_v11, %v1010_v7 }
 0x500   : > { %1028 = vst.msk [vmem:[%s569_s22] sm:$0xff] %vm640_vm1, %v1027_v12 }
 0x501 PF: > { %p1277_p1 = scmp.eq.s32.totalorder %s1503_s28, 0 }
 0x503   : > { %1032 = sbr.rel (%p1277_p1) target bundleno = 1292 (0x50c), region = 84 }
 0x508   : > { %v1033_v13 = vld [vmem:[%s569_s22] sm:$0xff] }
 0x509   : > { %v1034_v14 = vadd.f32 %v1033_v13, %v1010_v7 }
 0x50b   : > { %1035 = vst.msk [vmem:[%s569_s22] sm:$0xff] %vm640_vm1, %v1034_v14 }
 0x50c PF: > { %s1279_s17 = sshll.u32 %s1507_s29, 7  ;;  %s1844_s24 = sld [smem:[#allocation16_spill]] }
 0x50d   : > { %s1051_s23 = sshll.u32 %s569_s22, 4  ;;  %s1845_s13 = sand.u32 1, %s1495_s26   ;;  %s1052_s23 = int_to_ptr.vmem [resolvable:$true] %s1051_s23 }
 0x50e   : > { %s1037_s25 = scalar_lea.sflag [#allocation5], %s1845_s13  ;;  %s1427_s27 = scalar_lea.vmem %s1052_s23, 128 }
 0x50f   : > { %p1428_p2 = scmp.ne.s32.totalorder %s1052_s23, %s1427_s27  ;;  %s1525_s28 = smov [#allocation4]  }
 0x510   : > { %s1431_s30 = sshll.u32 %s1525_s28, 4  ;;  %s1432_s30 = int_to_ptr.vmem [resolvable:$false] %s1431_s30 }
 0x511   : > { %p1429_p4 = pnand %p1428_p2, %p1645_p3  ;;  %s1433_s14 = scalar_lea.vmem %s1432_s30, 256 }
 0x512   : > { %s1049_s16 = scalar_lea.hbm %s1844_s24, %s1279_s17  ;;  %p1434_p6 = scmp.lt.s32.totalorder %s1052_s23, %s1432_s30 }
 0x513   : > { %p1430_p5 = pneg %p1429_p4  ;;  %p1435_p7 = scmp.lt.s32.totalorder %s1433_s14, %s1427_s27 }
 0x515   : > { %p1436_p8 = por %p1435_p7, %p1434_p6 }
 0x517   : > { %p1437_p10 = pnand %p1436_p8, %p1430_p5 }
 0x519   : > { %1440 = shalt.err (!%p1437_p10)
}
 0x51a   : > { %s1441_s29 = scalar_lea.hbm %s1049_s16, 128  ;;  %s1445_s18 = scalar_lea.hbm %s1844_s24, 256 }
 0x51b   : > { %p1442_p11 = scmp.ne.s32.totalorder %s1049_s16, %s1441_s29  ;;  %p1446_p0 = scmp.lt.s32.totalorder %s1049_s16, %s1844_s24 }
 0x51c   : > { %p1447_p1 = scmp.lt.s32.totalorder %s1445_s18, %s1441_s29 }
 0x51d   : > { %p1443_p12 = pnand %p1442_p11, %p1645_p3 }
 0x51e   : > { %p1448_p2 = por %p1447_p1, %p1446_p0 }
 0x51f   : > { %p1444_p13 = pneg %p1443_p12 }
 0x521   : > { %p1449_p4 = pnand %p1448_p2, %p1444_p13 }
 0x523   : > { %1452 = shalt.err (!%p1449_p4)
}
 0x524   : > { %1342 = dma.vmem_to_hbm [thread:$0]  (%p1645_p3), %s1052_s23, 128, %s1049_s16, %s1037_s25  }
 0x525 PF: > { %s1846_s19 = sld [smem:[#allocation11_spill]] }
 0x526   : > { %s1847_s13 = sld [smem:[#allocation7_spill]] }
 0x52b   : > { %p1348_p5 = scmp.ge.s32.totalorder %s1846_s19, 2 }
 0x52c   : > { %s1063_s28 = sand.u32 1, %s1847_s13  }
 0x52d   : > { %p1345_p6 = pnand %p1348_p5, %p1655_p9  ;;  %s1064_s30 = scalar_lea.sflag [#allocation5], %s1063_s28 }
 0x52f   : > { %p1346_p7 = pneg %p1345_p6 }
 0x531   : > { %1486 = dma.done.wait (%p1346_p7), %s1064_s30, 128  }
 0x532   : > { %1488 = vsyncadd (%p1346_p7), %s1064_s30, 4294967168  ;;  %s26_s15 = sadd.s32 1, %s1846_s19   ;;  %s1849_s14 = sld [smem:[#allocation8_spill]] }
 0x533   : > { %p23_p8 = scmp.ge.s32.totalorder %s26_s15, 10   ;;  %s1850_s27 = sld [smem:[#allocation15_spill]] }
 0x534   : > { %s1851_s28 = sld [smem:[#allocation9_spill]]  ;;  %s1855_s25 = smov %s1495_s26 }
 0x535   : > { %s1852_s29 = sld [smem:[#allocation10_spill]] }
 0x536   : > { %s1853_s30 = sld [smem:[#allocation12_spill]] }
 0x537   : > { %s1854_s20 = sld [smem:[#allocation13_spill]] }
 0x538   : > { %s1856_s26 = smov %s1849_s14 }
 0x539   :  { %25 = sbr.rel (!%p23_p8) target bundleno = 7 (0x7), region = 151 }
 0x53d   : > { %s1857_s14 = smov %s1854_s20 }
 0x53e   :  { %1069 = vsyncpa [#allocation5], 1 }
 0x53f   :  { %1071 = vsyncpa [#allocation5 + $0x1], 1 }

</bundles_post_ra>
